<compile_context>
chip_gen: v7x
topology: tpu7x:2x2x1
jax: 0.10.0
libtpu: 0.0.40
codegen_flags: <defaults>
</compile_context>

<pallas_src>
import functools

import jax
import jax.numpy as jnp
from jax import lax
from jax.experimental import pallas as pl
from jax.experimental.pallas import tpu as pltpu


def _bpr_partial_kernel(logit_ref, diag_ref, out_ref, acc_ref, *,
                        B, tm, tiles_per_split):
    """Accumulates sum(logsigmoid(diag - logit)) over the row tiles of one split."""
    c = pl.program_id(0)            # core-split index ("parallel")
    i = pl.program_id(1)            # row-tile index inside the split ("arbitrary")
    n_inner = pl.num_programs(1)

    @pl.when(i == 0)
    def _init():
        acc_ref[...] = jnp.zeros_like(acc_ref)

    x = logit_ref[...].astype(jnp.float32)      # (tm, B) tile of logits
    d = diag_ref[...].astype(jnp.float32)       # (tm, 1) matching diagonal slice

    diff = d - x                                 # (tm, B)
    # Numerically stable logsigmoid(z) = min(z, 0) - log1p(exp(-|z|)).
    logsig = jnp.minimum(diff, 0.0) - jnp.log1p(jnp.exp(-jnp.abs(diff)))

    # Mask rows past B (partial last tile / clamped duplicate tile on uneven splits).
    tile_idx = c * tiles_per_split + i           # unclamped global tile index
    row = tile_idx * tm + lax.broadcasted_iota(jnp.int32, logsig.shape, 0)
    masked = jnp.where(row < B, logsig, 0.0)

    acc_ref[...] += jnp.sum(masked, keepdims=True)   # (1, 1) accumulator

    @pl.when(i == n_inner - 1)
    def _finalize():
        # Single lane-dense (1, 128) store per split; wrapper reads lane 0.
        out_ref[...] = jnp.broadcast_to(acc_ref[...], out_ref.shape)


def bpr_loss_ref(logit: jax.Array) -> jax.Array:
    """Pure-JAX reference matching the PyTorch module."""
    x = logit.astype(jnp.float32)
    diag = jnp.diag(x)[:, None]
    diff = diag - x
    return -jnp.mean(jax.nn.log_sigmoid(diff))


def bpr_loss(logit: jax.Array, *, tm: int | None = None,
             nsplit: int = 2, min_pallas_b: int = 64) -> jax.Array:
    """BPR loss for a square (B, B) logit matrix. Returns a float32 scalar."""
    B0, B1 = logit.shape
    assert B0 == B1, "BPRLoss expects a square (B, B) logit matrix"
    B = B0

    if B < min_pallas_b:
        # Tiny problems: launch/grid overhead dominates a lane-sparse block.
        return bpr_loss_ref(logit)

    itemsize = jnp.dtype(logit.dtype).itemsize

    # Row-tile size: target ~8 MiB per (double-buffered) input buffer so it
    # fits comfortably on v7x (64 MiB VMEM) as well as v5e/v6e.
    if tm is None:
        tm = max(8, (8 << 20) // max(1, B * itemsize))
    tm = min(tm, B)
    if tm < B:
        tm = max(8, (tm // 8) * 8)   # sublane-aligned unless it is the full dim

    # Diagonal computed once in the wrapper, streamed as a (B, 1) side input.
    diag = jnp.diagonal(logit).reshape(B, 1)

    total_tiles = pl.cdiv(B, tm)
    nsplit = max(1, min(nsplit, total_tiles))
    tiles_per_split = pl.cdiv(total_tiles, nsplit)

    def _tile_idx(c, i):
        # Clamp so the DMA block index never leaves the array; masked in-kernel.
        return jnp.minimum(c * tiles_per_split + i, total_tiles - 1)

    logit_map = lambda c, i: (_tile_idx(c, i), 0)
    diag_map = lambda c, i: (_tile_idx(c, i), 0)
    out_map = lambda c, i: (0, c)

    kernel = functools.partial(_bpr_partial_kernel, B=B, tm=tm,
                               tiles_per_split=tiles_per_split)

    tile_bytes = tm * B * itemsize
    vmem_limit = int(min(64 << 20, max(16 << 20, 4 * tile_bytes)))

    out = pl.pallas_call(
        kernel,
        out_shape=jax.ShapeDtypeStruct((1, nsplit * 128), jnp.float32),
        grid_spec=pltpu.PrefetchScalarGridSpec(
            num_scalar_prefetch=0,
            grid=(nsplit, tiles_per_split),
            in_specs=[
                pl.BlockSpec((tm, B), logit_map),   # streamed in native dtype
                pl.BlockSpec((tm, 1), diag_map),
            ],
            out_specs=pl.BlockSpec((1, 128), out_map),
            scratch_shapes=[pltpu.VMEM((1, 1), jnp.float32)],
        ),
        compiler_params=pltpu.CompilerParams(
            dimension_semantics=("parallel", "arbitrary"),
            vmem_limit_bytes=vmem_limit,
        ),
    )(logit, diag)

    partial_sums = out.reshape(nsplit, 128)[:, 0]   # lane 0 of each split
    return -jnp.sum(partial_sums) / jnp.float32(B * B)


if __name__ == "__main__":
    key = jax.random.PRNGKey(0)
    k1, k2 = jax.random.split(key)

    # 1) f32, tile-divisible case (exercises the pipelined multi-tile path).
    B1 = 256
    logit1 = jax.random.normal(k1, (B1, B1), dtype=jnp.float32)
    loss1 = bpr_loss(logit1, tm=64)
    jax.block_until_ready(loss1)
    ref1 = bpr_loss_ref(logit1)
    assert jnp.allclose(loss1, ref1, rtol=1e-4, atol=1e-5), (loss1, ref1)

    # 2) bf16 streaming + ragged last tile (B not a multiple of the tile size).
    B2 = 200
    logit2 = jax.random.normal(k2, (B2, B2), dtype=jnp.float32).astype(jnp.bfloat16)
    loss2 = bpr_loss(logit2, tm=64)
    jax.block_until_ready(loss2)
    ref2 = bpr_loss_ref(logit2)
    assert jnp.allclose(loss2, ref2, rtol=1e-4, atol=1e-5), (loss2, ref2)

    # 3) Tiny-B path dispatches to pure JAX (kernel overhead would dominate).
    B3 = 8
    logit3 = jax.random.normal(key, (B3, B3), dtype=jnp.float32)
    loss3 = bpr_loss(logit3)
    jax.block_until_ready(loss3)
    ref3 = bpr_loss_ref(logit3)
    assert jnp.allclose(loss3, ref3, rtol=1e-5, atol=1e-6), (loss3, ref3)

    print("KERNEL_OK")
</pallas_src>

<mosaic_0001>
module attributes {stable_mosaic.version = 11 : i64} {
  func.func @_bpr_partial_kernel(%arg0: i32, %arg1: i32, %arg2: memref<64x256xf32, #tpu.memory_space<vmem>>, %arg3: memref<64x1xf32, #tpu.memory_space<vmem>>, %arg4: memref<1x128xf32, #tpu.memory_space<vmem>>, %arg5: memref<1x1xf32, #tpu.memory_space<vmem>>) attributes {dimension_semantics = [#tpu.dimension_semantics<parallel>, #tpu.dimension_semantics<arbitrary>], iteration_bounds = array<i64: 2, 2>, scalar_prefetch = 0 : i64, scratch_operands = 1 : i64, tpu.core_type = #tpu.core_type<tc>, window_params = [{transform_indices = @transform_0, window_bounds = array<i64: 64, 256>}, {transform_indices = @transform_1, window_bounds = array<i64: 64, 1>}, {transform_indices = @transform_2, window_bounds = array<i64: 1, 128>}]} {
    %c0_i32 = arith.constant 0 : i32
    %0 = arith.cmpi eq, %arg1, %c0_i32 : i32
    %1 = arith.extui %0 : i1 to i32
    %c0_i32_0 = arith.constant 0 : i32
    %2 = arith.cmpi ne, %1, %c0_i32_0 : i32
    scf.if %2 {
      %cst_12 = arith.constant 0.000000e+00 : f32
      %36 = vector.broadcast %cst_12 : f32 to vector<1x1xf32>
      %c0_13 = arith.constant 0 : index
      %c0_14 = arith.constant 0 : index
      %37 = vector.load %arg5[%c0_13, %c0_14] : memref<1x1xf32, #tpu.memory_space<vmem>>, vector<1x1xf32>
      tpu.vector_store %arg5[%c0_13, %c0_14], %36 {strides = array<i32>} : memref<1x1xf32, #tpu.memory_space<vmem>>, vector<1x1xf32>,
    } else {
    }
    %c0 = arith.constant 0 : index
    %c0_1 = arith.constant 0 : index
    %3 = vector.load %arg2[%c0, %c0_1] : memref<64x256xf32, #tpu.memory_space<vmem>>, vector<64x256xf32>
    %c0_2 = arith.constant 0 : index
    %c0_3 = arith.constant 0 : index
    %4 = vector.load %arg3[%c0_2, %c0_3] : memref<64x1xf32, #tpu.memory_space<vmem>>, vector<64x1xf32>
    %5 = vector.broadcast %4 : vector<64x1xf32> to vector<64x256xf32>
    %6 = arith.subf %5, %3 : vector<64x256xf32>
    %cst = arith.constant 0.000000e+00 : f32
    %7 = vector.broadcast %cst : f32 to vector<64x256xf32>
    %8 = arith.minimumf %6, %7 : vector<64x256xf32>
    %9 = math.absf %6 : vector<64x256xf32>
    %cst_4 = arith.constant 0.000000e+00 : f32
    %10 = vector.broadcast %cst_4 : f32 to vector<64x256xf32>
    %11 = arith.subf %10, %9 : vector<64x256xf32>
    %12 = math.exp %11 : vector<64x256xf32>
    %13 = math.log1p %12 : vector<64x256xf32>
    %14 = arith.subf %8, %13 : vector<64x256xf32>
    %c2_i32 = arith.constant 2 : i32
    %15 = arith.muli %arg0, %c2_i32 : i32
    %16 = arith.addi %15, %arg1 : i32
    %c64_i32 = arith.constant 64 : i32
    %17 = arith.muli %16, %c64_i32 : i32
    %18 = tpu.iota {dimensions = array<i32: 0>} : vector<64x256xi32>
    %19 = vector.broadcast %17 : i32 to vector<64x256xi32>
    %20 = arith.addi %19, %18 : vector<64x256xi32>
    %c256_i32 = arith.constant 256 : i32
    %21 = vector.broadcast %c256_i32 : i32 to vector<64x256xi32>
    %22 = arith.cmpi slt, %20, %21 : vector<64x256xi32>
    %cst_5 = arith.constant 0.000000e+00 : f32
    %23 = vector.broadcast %cst_5 : f32 to vector<64x256xf32>
    %24 = arith.select %22, %14, %23 : vector<64x256xi1>, vector<64x256xf32>
    %c0_6 = arith.constant 0 : index
    %c0_7 = arith.constant 0 : index
    %25 = vector.load %arg5[%c0_6, %c0_7] : memref<1x1xf32, #tpu.memory_space<vmem>>, vector<1x1xf32>
    %26 = vector.shape_cast %24 : vector<64x256xf32> to vector<1x64x256xf32>
    %cst_8 = arith.constant dense<0.000000e+00> : vector<1xf32>
    %27 = vector.multi_reduction <add>, %26, %cst_8 [1, 2] : vector<1x64x256xf32> to vector<1xf32>
    %28 = vector.shape_cast %27 : vector<1xf32> to vector<1x1x1xf32>
    %29 = vector.extract %28[0, 0, 0] : f32 from vector<1x1x1xf32>
    %30 = vector.broadcast %29 : f32 to vector<1x1xf32>
    %31 = arith.addf %25, %30 : vector<1x1xf32>
    %c0_9 = arith.constant 0 : index
    %c0_10 = arith.constant 0 : index
    %32 = vector.load %arg5[%c0_9, %c0_10] : memref<1x1xf32, #tpu.memory_space<vmem>>, vector<1x1xf32>
    tpu.vector_store %arg5[%c0_9, %c0_10], %31 {strides = array<i32>} : memref<1x1xf32, #tpu.memory_space<vmem>>, vector<1x1xf32>,
    %c1_i32 = arith.constant 1 : i32
    %33 = arith.cmpi eq, %arg1, %c1_i32 : i32
    %34 = arith.extui %33 : i1 to i32
    %c0_i32_11 = arith.constant 0 : i32
    %35 = arith.cmpi ne, %34, %c0_i32_11 : i32
    scf.if %35 {
      %c0_12 = arith.constant 0 : index
      %c0_13 = arith.constant 0 : index
      %36 = vector.load %arg5[%c0_12, %c0_13] : memref<1x1xf32, #tpu.memory_space<vmem>>, vector<1x1xf32>
      %37 = vector.shape_cast %36 : vector<1x1xf32> to vector<1x1xf32>
      %38 = vector.broadcast %37 : vector<1x1xf32> to vector<1x128xf32>
      %c0_14 = arith.constant 0 : index
      %c0_15 = arith.constant 0 : index
      %39 = vector.load %arg4[%c0_14, %c0_15] : memref<1x128xf32, #tpu.memory_space<vmem>>, vector<1x128xf32>
      tpu.vector_store %arg4[%c0_14, %c0_15], %38 {strides = array<i32>} : memref<1x128xf32, #tpu.memory_space<vmem>>, vector<1x128xf32>,
    } else {
    }
    return
  }
  func.func @transform_0(%arg0: i32, %arg1: i32) -> (i32, i32) {
    %c2_i32 = arith.constant 2 : i32
    %0 = arith.muli %arg0, %c2_i32 : i32
    %1 = arith.addi %0, %arg1 : i32
    %c3_i32 = arith.constant 3 : i32
    %2 = arith.minsi %1, %c3_i32 : i32
    %c0_i32 = arith.constant 0 : i32
    %c0_i32_0 = arith.constant 0 : i32
    return %2, %c0_i32 : i32, i32
  }
  func.func @transform_1(%arg0: i32, %arg1: i32) -> (i32, i32) {
    %c2_i32 = arith.constant 2 : i32
    %0 = arith.muli %arg0, %c2_i32 : i32
    %1 = arith.addi %0, %arg1 : i32
    %c3_i32 = arith.constant 3 : i32
    %2 = arith.minsi %1, %c3_i32 : i32
    %c0_i32 = arith.constant 0 : i32
    %c0_i32_0 = arith.constant 0 : i32
    return %2, %c0_i32 : i32, i32
  }
  func.func @transform_2(%arg0: i32, %arg1: i32) -> (i32, i32) {
    %c0_i32 = arith.constant 0 : i32
    %c0_i32_0 = arith.constant 0 : i32
    return %c0_i32, %arg0 : i32, i32
  }
}

</mosaic_0001>

<bundles_post_ra>
// kernel: tpu_custom_call.1
= control target key start
LH: loop header
LB: loop body
LE: loop exit
PB: predicated region body
PF: predicated region fallthrough
CT: control target
= control target key end

     0   :  { %7 = vsyncpa [#allocation4], 0  ;;  %s1690_s0 = inlined_call_operand.hbm [shape: f32[256,256], index: 0, kind: input, shape index: {}]   ;;  %s1691_s1 = inlined_call_operand.vmem [shape: f32[256,1], index: 1, kind: input, shape index: {}]   ;;  %s1692_s2 = inlined_call_operand.hbm [shape: f32[1,256], index: 2, kind: output, shape index: {}]  }
   0x1   :  { %9 = vsyncpa [#allocation4 + $0x1], 0 }
   0x2   :  { %10 = vsyncpa [#allocation5], 0 }
   0x3   :  { %12 = vsyncpa [#allocation5 + $0x1], 0  ;;  %s1137_s9 = smov 0   ;;  %s1139_s10 = smov 0  }
   0x4   :  { %s1141_s11 = smov 0   ;;  %s1143_s12 = smov 0  }
   0x5   :  { %s1145_s13 = smov 0   ;;  %s1147_s14 = smov 0  }
   0x6   :  { %s1149_s15 = smov 0   ;;  %s1151_s16 = smov 0  }
   0x7   :  { %s1153_s17 = smov 0   ;;  %s1155_s18 = smov 0  }
   0x8   :  { %s1157_s19 = smov 0  }
   0x9 LB: > { %s758_s20 = sadd.s32 4294967295, %s1113_s19   ;;  %s759_s21 = sadd.s32 4294967294, %s1113_s19   ;;  %s1113_s19 = sphi %s1157_s19, %s18_s19   ;;  %s1109_s18 = sphi %s1155_s18, %s1729_s18   ;;  %s1105_s17 = sphi %s1153_s17, %s1728_s17   ;;  %s1101_s16 = sphi %s1151_s16, %s1727_s16   ;;  %s1097_s15 = sphi %s1149_s15, %s1726_s15   ;;  %s1093_s14 = sphi %s1147_s14, %s1725_s14   ;;  %s1089_s13 = sphi %s1145_s13, %s1724_s13   ;;  %s1085_s12 = sphi %s1143_s12, %s1723_s12   ;;  %s1081_s11 = sphi %s1141_s11, %s1722_s11   ;;  %s1077_s10 = sphi %s1139_s10, %s1721_s10   ;;  %s1073_s9 = sphi %s1137_s9, %s1720_s9  }
   0xa   : > { %s27_s22 = sadd.s32 1, %s1105_s17  ;;  %s30_s23 = sadd.s32 1, %s1109_s18 }
   0xb   : > { %p28_p0 = scmp.ge.s32.totalorder %s27_s22, 2  ;;  %s760_s24 = sshll.u32 %s1109_s18, 1 }
   0xc   : > { %s35_s25 = sadd.s32 %s1105_s17, %s760_s24  ;;  %s45_s26 = sadd.s32 1, %s1093_s14 }
   0xd   : > { %s1731_s22 = smov (%p28_p0, %s27_s22), 0  ;;  %s1733_s23 = smov (!%p28_p0, %s30_s23), %s1109_s18 }
   0xe   : > { %p36_p1 = scmp.lt.s32.totalorder %s35_s25, 3  ;;  %p52_p2 = scmp.ne.s32.totalorder %s1093_s14, %s1089_s13 }
   0xf   : > { %p32_p3 = scmp.ge.s32.totalorder %s1733_s23, 2  ;;  %p53_p4 = scmp.eq.s32.totalorder %s1113_s19, 0 }
  0x10   : > { %s1735_s25 = smov (!%p36_p1, %s35_s25), 3  ;;  %p58_p6 = scmp.ne.s32.totalorder %s1089_s13, %s1085_s12 }
  0x11   : > { %s1737_s23 = smov (%p32_p3, %s1733_s23), 0  ;;  %p1207_p5 = por %p53_p4, %p52_p2 }
  0x12   : > { %s761_s28 = sshll.u32 %s1737_s23, 1  ;;  %p59_p7 = scmp.eq.s32.totalorder %s758_s20, 0 }
  0x13   : > { %s39_s29 = sadd.s32 %s761_s28, %s1731_s22  ;;  %s102_s30 = ssub.s32 %s1109_s18, %s1737_s23 }
  0x14   : > { %p40_p8 = scmp.lt.s32.totalorder %s39_s29, 3  ;;  %p1219_p9 = por %p59_p7, %p58_p6 }
  0x15   : > { %p103_p10 = scmp.eq.s32.totalorder %s102_s30, 0  ;;  %s105_s4 = sadd.s32 1, %s1081_s11 }
  0x16   : > { %s1739_s29 = smov (!%p40_p8, %s39_s29), 3  ;;  %p115_p11 = scmp.ne.s32.totalorder %s1081_s11, %s1077_s10 }
  0x17   : > { %s1225_s5 = scalar_select %p103_p10, %s1081_s11, %s105_s4  }
  0x18   : > { %s42_s6 = ssub.s32 %s1735_s25, %s1739_s29  ;;  %p116_p13 = scmp.eq.s32.totalorder %s758_s20, 3 }
  0x19   : > { %p43_p12 = scmp.eq.s32.totalorder %s42_s6, 0  ;;  %p121_p0 = scmp.ne.s32.totalorder %s1077_s10, %s1073_s9 }
  0x1a   : > { %p122_p1 = scmp.eq.s32.totalorder %s759_s21, 3  ;;  %p1238_p2 = por %p116_p13, %p115_p11 }
  0x1b   : > { %s1236_s7 = scalar_select %p43_p12, %s1093_s14, %s45_s26  }
  0x1c   : > { %s1696_s8 = scalar_select %p1238_p2, 1, 0 }
  0x1d   : > { %p1242_p3 = por %p122_p1, %p121_p0  ;;  %p799_p4 = scmp.lt.s32.totalorder %s1113_s19, 4 }
  0x1e   : > { %s142_s24 = sand.u32 1, %s1093_s14   ;;  %s784_s28 = sshll.u32 %s1735_s25, 11 }
  0x1f   : > { %s1697_s12 = scalar_select %p1242_p3, 1, 0 }
  0x20   : > { %s766_s29 = sshll.u32 %s142_s24, 7  ;;  %s1251_s20 = scalar_lea.hbm %s1690_s0, %s784_s28 }
  0x21   : > { %s146_s21 = scalar_lea.vmem [#allocation3], %s766_s29  ;;  %p1255_p6 = pnand %p799_p4, %p1207_p5 }
  0x22   : > { %s158_s26 = sshll.u32 %s146_s21, 4  ;;  %s1261_s25 = scalar_lea.sflag [#allocation4], %s142_s24  ;;  %s1259_s26 = int_to_ptr.vmem [resolvable:$true] %s158_s26 }
  0x23   : > { %s961_s30 = scalar_lea.hbm %s1251_s20, 2048  ;;  %p963_p8 = pneg %p1255_p6 }
  0x24   : > { %p962_p7 = scmp.ne.s32.totalorder %s1251_s20, %s961_s30  ;;  %s966_s29 = scalar_lea.hbm %s1690_s0, 8192 }
  0x25   : > { %p967_p5 = scmp.lt.u32.totalorder %s1251_s20, %s1690_s0  ;;  %p968_p12 = scmp.lt.u32.totalorder %s966_s29, %s961_s30 }
  0x26   : > { %p964_p10 = pnand %p963_p8, %p962_p7  ;;  %p970_p0 = scmp.lt.u32.totalorder %s961_s30, %s1251_s20 }
  0x27   : > { %p969_p13 = por %p968_p12, %p967_p5 }
  0x28   : > { %p965_p11 = pneg %p964_p10 }
  0x29   : > { %p971_p1 = por %p970_p0, %p969_p13 }
  0x2b   : > { %p972_p4 = pnand %p971_p1, %p965_p11 }
  0x2d   : > { %975 = shalt.err (!%p972_p4)
}
  0x2e   : > { %s976_s24 = scalar_lea.vmem %s1259_s26, 2048  ;;  %s1115_s28 = smov [#allocation3]  }
  0x2f   : > { %p977_p7 = scmp.ne.s32.totalorder %s1259_s26, %s976_s24  ;;  %s981_s27 = sshll.u32 %s1115_s28, 4  ;;  %s982_s27 = int_to_ptr.vmem [resolvable:$false] %s981_s27 }
  0x30   : > { %s983_s4 = scalar_lea.vmem %s982_s27, 4096  ;;  %p984_p2 = scmp.lt.s32.totalorder %s1259_s26, %s982_s27 }
  0x31   : > { %p979_p10 = pnand %p977_p7, %p963_p8  ;;  %p985_p5 = scmp.lt.s32.totalorder %s983_s4, %s976_s24 }
  0x33   : > { %p980_p3 = pneg %p979_p10  ;;  %p986_p12 = por %p985_p5, %p984_p2 }
  0x35   : > { %p987_p13 = pnand %p986_p12, %p980_p3 }
  0x37   : > { %990 = shalt.err (!%p987_p13)
}
  0x38   : > { %s1116_s30 = smov 256   ;;  %s1117_s29 = smov 16  }
  0x39   : > { %794 = dma.hbm_to_vmem [thread:$0]  (!%p1255_p6), %s1251_s20, 2048, %s1259_s26, %s1261_s25, %s1116_s30, %s1116_s30, %s1117_s29  }
  0x3a   : > { %p771_p8 = scmp.ge.s32.totalorder %s1113_s19, 1  ;;  %p183_p11 = scmp.lt.s32.totalorder %s1113_s19, 5 }
  0x3c   : > { %p184_p0 = pnand %p771_p8, %p183_p11 }
  0x3d   : > { %s189_s21 = sand.u32 (!%p184_p0), 1, %s1089_s13  }
  0x3e   : > { %187 = sbr.rel (%p184_p0) target bundleno = 670 (0x29e), region = 28  ;;  %s772_s24 = sshll.u32 (!%p184_p0), %s189_s21, 7 }
  0x3f   : > { %s190_s28 = scalar_lea.sflag (!%p184_p0), [#allocation4], %s189_s21  ;;  %s1292_s27 = scalar_lea.vmem (!%p184_p0), [#allocation3], %s772_s24 }
  0x45   : > { %1064 = dma.done.wait (%p1219_p9), %s190_s28, 2048  }
  0x46   : > { %1066 = vsyncadd (%p1219_p9), %s190_s28, 4294965248  ;;  %s220_s20 = sand.u32 1, %s1077_s10   ;;  %s773_s26 = sshll.u32 %s1101_s16, 1 }
  0x47   : > { %s1301_s6 = sadd.s32 %s1097_s15, %s773_s26  ;;  %s1310_s24 = scalar_lea.vmem [#allocation6], %s220_s20 }
  0x48   : > { %p229_p2 = scmp.lt.s32.totalorder %s1301_s6, 3  ;;  %p776_p9 = scmp.ne.s32.totalorder %s1097_s15, 0 }
  0x49   : > { %vm245_vm0 = vcmask (!%p776_p9), 0   ;;  %v1118_v0 = vmov (!%p776_p9), 0.0  }
  0x4a   : > { %s230_s25 = scalar_select %p229_p2, %s1301_s6, 3 }
  0x4b   : > { %244 = sbr.rel (%p776_p9) target bundleno = 82 (0x52), region = 36  ;;  %246 = vst.msk [vmem:[#allocation2] sm:$0x1] (!%p776_p9), %vm245_vm0, %v1118_v0 }
  0x4c   : > { %s774_s4 = sshll.u32 %s230_s25, 3 }
  0x4d   : > { %p232_p3 = scmp.lt.s32.totalorder %s774_s4, 31 }
  0x4f   : > { %s1741_s4 = smov (!%p232_p3, %s774_s4), 31 }
  0x50   : > { %s775_s30 = sshll.u32 %s1741_s4, 3 }
  0x51   : > { %s235_s3 = scalar_lea.vmem %s1691_s1, %s775_s30 }
  0x52 PF: > { %v265_v1 = vld [vmem:[%s235_s3 + $0x10] sm:$0xff]  ;;  %v263_v2 = vld [vmem:[%s235_s3] sm:$0xff]  ;;  %v1119_v3 = vmov 0   ;;  %v266_v4 = vld [vmem:[%s235_s3 + $0x18] sm:$0xff]  ;;  %v570_v47 = vlaneseq  ;;  %s778_s28 = sshll.u32 %s1301_s6, 6  ;;  %p779_p6 = scmp.ne.s32.totalorder %s1097_s15, 1 }
  0x53   : > { %895 = vset.pattern.permute.xlu1 %v1119_v3  ;;  %894 = vset.pattern.permute.xlu0 %v1119_v3  ;;  %v264_v5 = vld [vmem:[%s235_s3 + $0x8] sm:$0xff]  ;;  %v267_v7 = vld [vmem:[%s235_s3 + $0x20] sm:$0xff]  ;;  %v270_v8 = vld [vmem:[%s235_s3 + $0x38] sm:$0xff]  ;;  %v1358_v63 = vstv %s778_s28 }
  0x54   : > { %283 = vperm.xlu1 %895, %v265_v1   ;;  %273 = vperm.xlu0 %894, %v263_v2   ;;  %v268_v6 = vld [vmem:[%s235_s3 + $0x28] sm:$0xff]  ;;  %v269_v9 = vld [vmem:[%s235_s3 + $0x30] sm:$0xff]  ;;  %v250_v21 = vld [vmem:[%s1292_s27 + $0x18] sm:$0xff]  ;;  %v1349_v56 = vshrl.u32 %v570_v47, 7 }
  0x55   : > { %v251_v10 = vld [vmem:[%s1292_s27 + $0x20] sm:$0xff]  ;;  %v248_v12 = vld [vmem:[%s1292_s27 + $0x8] sm:$0xff]  ;;  %v249_v20 = vld [vmem:[%s1292_s27 + $0x10] sm:$0xff] }
  0x56   : > { %v247_v11 = vld [vmem:[%s1292_s27] sm:$0xff]  ;;  %v252_v14 = vld [vmem:[%s1292_s27 + $0x28] sm:$0xff]  ;;  %v253_v25 = vld [vmem:[%s1292_s27 + $0x30] sm:$0xff]  ;;  %v573_v62 = vadd.s32 16, %v1349_v56  ;;  %v574_v0 = vadd.s32 24, %v1349_v56  ;;  %v572_v3 = vadd.s32 8, %v1349_v56 }
  0x57   : > { %v254_v36 = vld [vmem:[%s1292_s27 + $0x38] sm:$0xff]  ;;  %v257_v44 = vld [vmem:[%s1292_s27 + $0x50] sm:$0xff] }
  0x58   : > { %288 = vperm.xlu1 %895, %v266_v4   ;;  %278 = vperm.xlu0 %894, %v264_v5   ;;  %v258_v55 = vld [vmem:[%s1292_s27 + $0x58] sm:$0xff]  ;;  %v576_v4 = vadd.s32 40, %v1349_v56 }
  0x59   : > { %v262_v47 = vld [vmem:[%s1292_s27 + $0x78] sm:$0xff] }
  0x5c   : > { %298 = vperm.xlu1 %895, %v268_v6   ;;  %293 = vperm.xlu0 %894, %v267_v7  }
  0x60   : > { %308 = vperm.xlu1 %895, %v270_v8   ;;  %303 = vperm.xlu0 %894, %v269_v9   ;;  %v575_v8 = vadd.s32 32, %v1349_v56 }
  0xd3   : > { %v284_v13 = vpop.permute.xlu1 %283  ;;  %v274_v15 = vpop.permute.xlu0 %273 }
  0xd4   : > { %v1317_v16 = vsub.f32 %v284_v13, %v251_v10  ;;  %v1319_v17 = vsub.f32 %v274_v15, %v247_v11  ;;  %v1321_v18 = vsub.f32 %v274_v15, %v248_v12  ;;  %v1323_v19 = vsub.f32 %v284_v13, %v252_v14 }
  0xd5   : > { %v1370_v10 = vadd.s32 %v1358_v63, %v573_v62  ;;  %v1374_v11 = vadd.s32 %v1358_v63, %v1349_v56  ;;  %v1377_v12 = vadd.s32 %v1358_v63, %v574_v0  ;;  %v1382_v14 = vadd.s32 %v1358_v63, %v572_v3 }
  0xd6   : > { %v343_v22 = vand.u32 2147483647, %v1319_v17  ;;  %v344_v23 = vand.u32 2147483647, %v1321_v18  ;;  %v347_v27 = vand.u32 2147483647, %v1317_v16  ;;  %v1385_v15 = vadd.s32 %v1358_v63, %v576_v4 }
  0xd7   : > { %v289_v24 = vpop.permute.xlu1 %288  ;;  %v279_v26 = vpop.permute.xlu0 %278  ;;  %v348_v32 = vand.u32 2147483647, %v1323_v19  ;;  %vm588_vm1 = vcmp.lt.s32.totalorder %v1374_v11, 256  ;;  %vm589_vm2 = vcmp.lt.s32.totalorder %v1382_v14, 256  ;;  %vm590_vm8 = vcmp.lt.s32.totalorder %v1370_v10, 256 }
  0xd8   : > { %v359_v28 = vsub.f32 0.0, %v343_v22  ;;  %v360_v29 = vsub.f32 0.0, %v344_v23  ;;  %v1331_v30 = vsub.f32 %v279_v26, %v249_v20  ;;  %v1333_v31 = vsub.f32 %v279_v26, %v250_v21 }
  0xd9   : > { %v1336_v33 = vsub.f32 %v289_v24, %v253_v25  ;;  %v363_v37 = vsub.f32 0.0, %v347_v27  ;;  %v364_v40 = vsub.f32 0.0, %v348_v32  ;;  %v1341_v41 = vsub.f32 %v289_v24, %v254_v36  ;;  %v255_v25 = vld [vmem:[%s1292_s27 + $0x40] sm:$0xff] }
  0xda   : > { %v375_v34 = vmul.f32 1.442695, %v359_v28  ;;  %v377_v35 = vmul.f32 1.442695, %v360_v29  ;;  %v345_v38 = vand.u32 2147483647, %v1331_v30  ;;  %v1390_v23 = vadd.s32 %v1358_v63, %v575_v8 }
  0xdb   : > { %v346_v39 = vand.u32 2147483647, %v1333_v31  ;;  %v349_v42 = vand.u32 2147483647, %v1336_v33  ;;  %v299_v43 = vpop.permute.xlu1 %298  ;;  %v383_v48 = vmul.f32 1.442695, %v363_v37  ;;  %v294_v24 = vpop.permute.xlu0 %293 }
  0xdc   : > { %896 = vpow2.f32 %v375_v34  ;;  %v361_v45 = vsub.f32 0.0, %v345_v38  ;;  %v1345_v51 = vsub.f32 %v299_v43, %v257_v44  ;;  %v385_v52 = vmul.f32 1.442695, %v364_v40  ;;  %v256_v34 = vld [vmem:[%s1292_s27 + $0x48] sm:$0xff] }
  0xdd   : > { %898 = vpow2.f32 %v377_v35  ;;  %v362_v46 = vsub.f32 0.0, %v346_v39  ;;  %v350_v53 = vand.u32 2147483647, %v1341_v41  ;;  %v365_v54 = vsub.f32 0.0, %v349_v42 }
  0xde   : > { %v379_v49 = vmul.f32 1.442695, %v361_v45  ;;  %v353_v57 = vand.u32 2147483647, %v1345_v51  ;;  %v1353_v60 = vsub.f32 %v299_v43, %v258_v55  ;;  %v1394_v26 = vadd.s32 48, %v1349_v56  ;;  %v261_v43 = vld [vmem:[%s1292_s27 + $0x70] sm:$0xff] }
  0xdf   : > { %v381_v50 = vmul.f32 1.442695, %v362_v46  ;;  %v366_v58 = vsub.f32 0.0, %v350_v53  ;;  %v387_v59 = vmul.f32 1.442695, %v365_v54  ;;  %v327_v32 = vmin.f32 %v1319_v17, 0.0  ;;  %v309_v42 = vpop.permute.xlu1 %308 }
  0xe0   : > { %900 = vpow2.f32 %v379_v49  ;;  %v369_v5 = vsub.f32 0.0, %v353_v57  ;;  %v354_v7 = vand.u32 2147483647, %v1353_v60  ;;  %v1403_v35 = vadd.s32 56, %v1349_v56 }
  0xe1   : > { %902 = vpow2.f32 %v383_v48  ;;  %v389_v6 = vmul.f32 1.442695, %v366_v58  ;;  %v328_v37 = vmin.f32 %v1321_v18, 0.0  ;;  %v1414_v46 = vsub.f32 %v294_v24, %v255_v25 }
  0xe2   : > { %904 = vpow2.f32 %v381_v50  ;;  %v395_v20 = vmul.f32 1.442695, %v369_v5  ;;  %v370_v22 = vsub.f32 0.0, %v354_v7  ;;  %v1418_v50 = vsub.f32 %v294_v24, %v256_v34 }
  0xe3   : > { %906 = vpow2.f32 %v385_v52  ;;  %v329_v53 = vmin.f32 %v1331_v30, 0.0  ;;  %v330_v54 = vmin.f32 %v1333_v31, 0.0  ;;  %v1423_v55 = vsub.f32 %v309_v42, %v261_v43 }
  0xe4   : > { %908 = vpow2.f32 %v387_v59  ;;  %v397_v49 = vmul.f32 1.442695, %v370_v22  ;;  %v1427_v62 = vsub.f32 %v309_v42, %v262_v47  ;;  %v352_v7 = vand.u32 2147483647, %v1418_v50  ;;  %v259_v42 = vld [vmem:[%s1292_s27 + $0x60] sm:$0xff] }
  0xe5   : > { %vm591_vm10 = vcmp.lt.s32.totalorder %v1377_v12, 256  ;;  %vm592_vm13 = vcmp.lt.s32.totalorder %v1390_v23, 256  ;;  %vm593_vm15 = vcmp.lt.s32.totalorder %v1385_v15, 256  ;;  %v341_v23 = vmin.f32 %v1423_v55, 0.0 }
  0xe6   : > { %v1355_v61 = vpop.eup %896 }
  0xe7   : > { %v1361_v1 = vpop.eup %898  ;;  %v407_v2 = vadd.f32 1.0, %v1355_v61  ;;  %v410_v38 = vmul.f32 -0.5, %v1355_v61 }
  0xe8   : > { %v416_v9 = vadd.f32 1.0, %v1361_v1  ;;  %v419_v39 = vmul.f32 -0.5, %v1361_v1  ;;  %v422_v3 = vand.u32 2147483647, %v1361_v1 }
  0xe9   : > { %910 = vlog2.f32 %v407_v2  ;;  %v411_v58 = vadd.f32 1.0, %v410_v38  ;;  %v413_v2 = vand.u32 2147483647, %v1355_v61 }
  0xea   : > { %v1379_v13 = vpop.eup %900  ;;  %912 = vlog2.f32 %v416_v9  ;;  %v420_v59 = vadd.f32 1.0, %v419_v39  ;;  %vm1450_vm4 = vcmp.lt.f32.partialorder %v422_v3, 0.0004427343 }
  0xeb   : > { %v1387_v21 = vpop.eup %902  ;;  %914 = vpow2.f32 %v389_v6  ;;  %v425_v40 = vadd.f32 1.0, %v1379_v13  ;;  %v428_v4 = vmul.f32 -0.5, %v1379_v13  ;;  %v351_v6 = vand.u32 2147483647, %v1414_v46 }
  0xec   : > { %v1396_v27 = vpop.eup %904  ;;  %v443_v44 = vadd.f32 1.0, %v1387_v21  ;;  %916 = vpow2.f32 %v395_v20  ;;  %v446_v9 = vmul.f32 -0.5, %v1387_v21  ;;  %v449_v20 = vand.u32 2147483647, %v1387_v21 }
  0xed   : > { %v1405_v36 = vpop.eup %906  ;;  %918 = vlog2.f32 %v425_v40  ;;  %v434_v48 = vadd.f32 1.0, %v1396_v27  ;;  %v412_v25 = vmul.f32 %v1355_v61, %v411_v58  ;;  %v421_v38 = vmul.f32 %v1361_v1, %v420_v59  ;;  %v304_v40 = vpop.permute.xlu0 %303 }
  0xee   : > { %v452_v52 = vadd.f32 1.0, %v1405_v36  ;;  %v1425_v57 = vpop.eup %908  ;;  %v437_v39 = vmul.f32 -0.5, %v1396_v27  ;;  %v455_v43 = vmul.f32 -0.5, %v1405_v36  ;;  %vm1446_vm3 = vcmp.lt.f32.partialorder %v413_v2, 0.0004427343 }
  0xef   : > { %920 = vlog2.f32 %v434_v48  ;;  %v461_v22 = vadd.f32 1.0, %v1425_v57  ;;  %v429_v61 = vadd.f32 1.0, %v428_v4  ;;  %v458_v59 = vand.u32 2147483647, %v1405_v36 }
  0xf0   : > { %922 = vlog2.f32 %v443_v44  ;;  %v357_v2 = vand.u32 2147483647, %v1423_v55  ;;  %v1464_v3 = vsub.f32 %v304_v40, %v259_v42  ;;  %vm1467_vm5 = vcmp.lt.f32.partialorder %v449_v20, 0.0004427343 }
  0xf1   : > { %924 = vpow2.f32 %v397_v49  ;;  %v431_v49 = vand.u32 2147483647, %v1379_v13  ;;  %v430_v42 = vmul.f32 %v1379_v13, %v429_v61  ;;  %vm1507_vm9 = vcmp.lt.f32.partialorder %v458_v59, 0.0004427343 }
  0xf2   : > { %926 = vlog2.f32 %v452_v52  ;;  %v367_v52 = vsub.f32 0.0, %v351_v6  ;;  %v373_v30 = vsub.f32 0.0, %v357_v2  ;;  %v355_v2 = vand.u32 2147483647, %v1464_v3 }
  0xf3   : > { %v911_v0 = vpop.eup %910  ;;  %928 = vlog2.f32 %v461_v22  ;;  %v447_v22 = vadd.f32 1.0, %v446_v9  ;;  %vm432_vm6 = vcmp.lt.f32.partialorder %v431_v49, 0.0004427343 }
  0xf4   : > { %v409_v5 = vmul.f32 0.6931472, %v911_v0  ;;  %v913_v8 = vpop.eup %912  ;;  %v391_v45 = vmul.f32 1.442695, %v367_v52 }
  0xf5   : > { %v1438_v24 = vpop.eup %914  ;;  %v418_v34 = vmul.f32 0.6931472, %v913_v8  ;;  %v438_v8 = vadd.f32 1.0, %v437_v39  ;;  %v456_v39 = vadd.f32 1.0, %v455_v43 }
  0xf6   : > { %v415_v1 = vsel %vm1446_vm3, %v412_v25, %v409_v5  ;;  %v1459_v58 = vpop.eup %916  ;;  %v470_v0 = vadd.f32 1.0, %v1438_v24  ;;  %v440_v5 = vand.u32 2147483647, %v1396_v27  ;;  %v368_v25 = vsub.f32 0.0, %v352_v7 }
  0xf7   : > { %v424_v48 = vsel %vm1450_vm4, %v421_v38, %v418_v34  ;;  %v919_v4 = vpop.eup %918  ;;  %v551_v6 = vsub.f32 %v327_v32, %v415_v1  ;;  %v497_v28 = vadd.f32 1.0, %v1459_v58  ;;  %v439_v18 = vmul.f32 %v1396_v27, %v438_v8 }
  0xf8   : > { %v552_v38 = vsub.f32 %v328_v37, %v424_v48  ;;  %v427_v44 = vmul.f32 0.6931472, %v919_v4  ;;  %930 = vlog2.f32 %v470_v0  ;;  %v393_v13 = vmul.f32 1.442695, %v368_v25  ;;  %v260_v37 = vld [vmem:[%s1292_s27 + $0x68] sm:$0xff] }
  0xf9   : > { %v921_v47 = vpop.eup %920  ;;  %932 = vpow2.f32 %v391_v45  ;;  %v596_v43 = vsel %vm588_vm1, %v551_v6, 0.0  ;;  %vm441_vm7 = vcmp.lt.f32.partialorder %v440_v5, 0.0004427343  ;;  %v358_v1 = vand.u32 2147483647, %v1427_v62 }
  0xfa   : > { %v923_v7 = vpop.eup %922  ;;  %v433_v20 = vsel %vm432_vm6, %v430_v42, %v427_v44  ;;  %v436_v29 = vmul.f32 0.6931472, %v921_v47  ;;  %v597_v61 = vsel %vm588_vm1, %v552_v38, 0.0  ;;  %934 = vpow2.f32 %v393_v13 }
  0xfb   : > { %v1477_v17 = vpop.eup %924  ;;  %v553_v32 = vsub.f32 %v329_v53, %v433_v20  ;;  %v445_v48 = vmul.f32 0.6931472, %v923_v7  ;;  %v448_v45 = vmul.f32 %v1387_v21, %v447_v22  ;;  %v374_v49 = vsub.f32 0.0, %v358_v1 }
  0xfc   : > { %v927_v9 = vpop.eup %926  ;;  %v442_v27 = vsel %vm441_vm7, %v439_v18, %v436_v29  ;;  %v1492_v52 = vsub.f32 %v304_v40, %v260_v37  ;;  %v613_v11 = vadd.f32 %v597_v61, %v596_v43  ;;  %v464_v4 = vmul.f32 -0.5, %v1425_v57 }
  0xfd   : > { %v598_v53 = vsel %vm589_vm2, %v553_v32, 0.0  ;;  %v454_v0 = vmul.f32 0.6931472, %v927_v9  ;;  %v403_v8 = vmul.f32 1.442695, %v373_v30  ;;  %v554_v5 = vsub.f32 %v330_v54, %v442_v27  ;;  %v929_v25 = vpop.eup %928 }
  0xfe   : > { %936 = vlog2.f32 %v497_v28  ;;  %v405_v29 = vmul.f32 1.442695, %v374_v49  ;;  %v451_v21 = vsel %vm1467_vm5, %v448_v45, %v445_v48  ;;  %v614_v6 = vadd.f32 %v613_v11, %v598_v53 }
  0xff   : > { %938 = vpow2.f32 %v403_v8  ;;  %v356_v40 = vand.u32 2147483647, %v1492_v52  ;;  %v467_v38 = vand.u32 2147483647, %v1425_v57  ;;  %v506_v44 = vadd.f32 1.0, %v1477_v17 }
 0x100   : > { %940 = vpow2.f32 %v405_v29  ;;  %v371_v42 = vsub.f32 0.0, %v355_v2  ;;  %v457_v31 = vmul.f32 %v1405_v36, %v456_v39  ;;  %v465_v28 = vadd.f32 1.0, %v464_v4 }
 0x101   : > { %v473_v54 = vmul.f32 -0.5, %v1438_v24  ;;  %v372_v47 = vsub.f32 0.0, %v356_v40  ;;  %v1707_v7 = vmin.f32 %v1317_v16, 0.0  ;;  %v599_v18 = vsel %vm589_vm2, %v554_v5, 0.0 }
 0x102   : > { %v931_v22 = vpop.eup %930  ;;  %v399_v32 = vmul.f32 1.442695, %v371_v42  ;;  %v460_v39 = vsel %vm1507_vm9, %v457_v31, %v454_v0  ;;  %v463_v37 = vmul.f32 0.6931472, %v929_v25  ;;  %v615_v36 = vadd.f32 %v614_v6, %v599_v18 }
 0x103   : > { %v555_v20 = vsub.f32 %v1707_v7, %v451_v21  ;;  %v1515_v13 = vpop.eup %932  ;;  %v401_v59 = vmul.f32 1.442695, %v372_v47  ;;  %vm1520_vm11 = vcmp.lt.f32.partialorder %v467_v38, 0.0004427343  ;;  %v476_v16 = vand.u32 2147483647, %v1438_v24 }
 0x104   : > { %942 = vlog2.f32 %v506_v44  ;;  %v479_v14 = vadd.f32 1.0, %v1515_v13  ;;  %v1526_v43 = vpop.eup %934  ;;  %v466_v61 = vmul.f32 %v1425_v57, %v465_v28  ;;  %v474_v1 = vadd.f32 1.0, %v473_v54 }
 0x105   : > { %v500_v48 = vmul.f32 -0.5, %v1459_v58  ;;  %944 = vpow2.f32 %v399_v32  ;;  %v1710_v27 = vmin.f32 %v1323_v19, 0.0  ;;  %v600_v45 = vsel %vm590_vm8, %v555_v20, 0.0 }
 0x106   : > { %946 = vlog2.f32 %v479_v14  ;;  %v488_v53 = vadd.f32 1.0, %v1526_v43  ;;  %v469_v49 = vsel %vm1520_vm11, %v466_v61, %v463_v37  ;;  %v472_v0 = vmul.f32 0.6931472, %v931_v22 }
 0x107   : > { %v556_v30 = vsub.f32 %v1710_v27, %v460_v39  ;;  %v616_v11 = vadd.f32 %v615_v36, %v600_v45  ;;  %948 = vpow2.f32 %v401_v59  ;;  %v334_v4 = vmin.f32 %v1341_v41, 0.0 }
 0x108   : > { %v937_v57 = vpop.eup %936  ;;  %v337_v8 = vmin.f32 %v1345_v51, 0.0  ;;  %v509_v19 = vmul.f32 -0.5, %v1477_v17  ;;  %950 = vlog2.f32 %v488_v53  ;;  %v475_v29 = vmul.f32 %v1438_v24, %v474_v1 }
 0x109   : > { %v1540_v5 = vpop.eup %938  ;;  %vm1543_vm12 = vcmp.lt.f32.partialorder %v476_v16, 0.0004427343  ;;  %v503_v25 = vand.u32 2147483647, %v1459_v58  ;;  %v482_v21 = vmul.f32 -0.5, %v1515_v13  ;;  %v601_v41 = vsel %vm590_vm8, %v556_v30, 0.0 }
 0x10a   : > { %v1549_v6 = vpop.eup %940  ;;  %v1713_v51 = vmin.f32 %v1336_v33, 0.0  ;;  %v501_v38 = vadd.f32 1.0, %v500_v48  ;;  %v533_v44 = vadd.f32 1.0, %v1540_v5  ;;  %v478_v24 = vsel %vm1543_vm12, %v475_v29, %v472_v0 }
 0x10b   : > { %v617_v42 = vadd.f32 %v616_v11, %v601_v41  ;;  %v512_v31 = vand.u32 2147483647, %v1477_v17  ;;  %v491_v28 = vmul.f32 -0.5, %v1526_v43  ;;  %v338_v54 = vmin.f32 %v1353_v60, 0.0 }
 0x10c   : > { %v557_v40 = vsub.f32 %v1713_v51, %v469_v49  ;;  %v510_v10 = vadd.f32 1.0, %v509_v19  ;;  %v335_v47 = vmin.f32 %v1414_v46, 0.0  ;;  %v542_v33 = vadd.f32 1.0, %v1549_v6 }
 0x10d   : > { %v499_v22 = vmul.f32 0.6931472, %v937_v57  ;;  %vm1564_vm14 = vcmp.lt.f32.partialorder %v503_v25, 0.0004427343  ;;  %v336_v7 = vmin.f32 %v1418_v50, 0.0  ;;  %v483_v20 = vadd.f32 1.0, %v482_v21 }
 0x10e   : > { %v943_v18 = vpop.eup %942  ;;  %v558_v32 = vsub.f32 %v334_v4, %v478_v24  ;;  %v602_v39 = vsel %vm591_vm10, %v557_v40, 0.0  ;;  %v485_v60 = vand.u32 2147483647, %v1515_v13  ;;  %952 = vlog2.f32 %v533_v44 }
 0x10f   : > { %v1573_v46 = vpop.eup %944  ;;  %v502_v37 = vmul.f32 %v1459_v58, %v501_v38  ;;  %vm1576_vm0 = vcmp.lt.f32.partialorder %v512_v31, 0.0004427343  ;;  %v492_v50 = vadd.f32 1.0, %v491_v28  ;;  %v618_v59 = vadd.f32 %v617_v42, %v602_v39 }
 0x110   : > { %v947_v9 = vpop.eup %946  ;;  %v511_v16 = vmul.f32 %v1477_v17, %v510_v10  ;;  %v494_v14 = vand.u32 2147483647, %v1526_v43  ;;  %v515_v61 = vadd.f32 1.0, %v1573_v46  ;;  %954 = vlog2.f32 %v542_v33 }
 0x111   : > { %v1583_v1 = vpop.eup %948  ;;  %v505_v48 = vsel %vm1564_vm14, %v502_v37, %v499_v22  ;;  %v508_v58 = vmul.f32 0.6931472, %v943_v18  ;;  %v481_v27 = vmul.f32 0.6931472, %v947_v9  ;;  %v484_v30 = vmul.f32 %v1515_v13, %v483_v20 }
 0x112   : > { %v951_v45 = vpop.eup %950  ;;  %v603_v53 = vsel %vm591_vm10, %v558_v32, 0.0  ;;  %vm486_vm1 = vcmp.lt.f32.partialorder %v485_v60, 0.0004427343  ;;  %956 = vlog2.f32 %v515_v61  ;;  %v524_v17 = vadd.f32 1.0, %v1583_v1 }
 0x113   : > { %v487_v49 = vsel %vm486_vm1, %v484_v30, %v481_v27  ;;  %v490_v0 = vmul.f32 0.6931472, %v951_v45  ;;  %v493_v11 = vmul.f32 %v1526_v43, %v492_v50  ;;  %v619_v57 = vadd.f32 %v618_v59, %v603_v53 }
 0x114   : > { %v561_v4 = vsub.f32 %v337_v8, %v505_v48  ;;  %vm495_vm2 = vcmp.lt.f32.partialorder %v494_v14, 0.0004427343  ;;  %v559_v19 = vsub.f32 %v335_v47, %v487_v49  ;;  %958 = vlog2.f32 %v524_v17 }
 0x115   : > { %v514_v13 = vsel %vm1576_vm0, %v511_v16, %v508_v58  ;;  %v496_v29 = vsel %vm495_vm2, %v493_v11, %v490_v0  ;;  %v536_v12 = vmul.f32 -0.5, %v1540_v5  ;;  %v518_v2 = vmul.f32 -0.5, %v1573_v46 }
 0x116   : > { %v560_v25 = vsub.f32 %v336_v7, %v496_v29  ;;  %v604_v21 = vsel %vm592_vm13, %v559_v19, 0.0  ;;  %v527_v41 = vmul.f32 -0.5, %v1583_v1  ;;  %v545_v43 = vmul.f32 -0.5, %v1549_v6 }
 0x117   : > { %v620_v8 = vadd.f32 %v619_v57, %v604_v21  ;;  %v586_v51 = vadd.s32 %v1358_v63, %v1394_v26  ;;  %v562_v38 = vsub.f32 %v338_v54, %v514_v13  ;;  %v587_v24 = vadd.s32 %v1358_v63, %v1403_v35 }
 0x118   : > { %v953_v40 = vpop.eup %952  ;;  %v605_v44 = vsel %vm592_vm13, %v560_v25, 0.0  ;;  %v606_v42 = vsel %vm593_vm15, %v561_v4, 0.0  ;;  %v537_v28 = vadd.f32 1.0, %v536_v12  ;;  %v519_v10 = vadd.f32 1.0, %v518_v2  ;;  %v612_v12 = vld [vmem:[#allocation2] sm:$0x1] }
 0x119   : > { %v621_v31 = vadd.f32 %v620_v8, %v605_v44  ;;  %v539_v33 = vand.u32 2147483647, %v1540_v5  ;;  %v521_v22 = vand.u32 2147483647, %v1573_v46  ;;  %v528_v26 = vadd.f32 1.0, %v527_v41 }
 0x11a   : > { %v955_v47 = vpop.eup %954  ;;  %v546_v34 = vadd.f32 1.0, %v545_v43  ;;  %v535_v7 = vmul.f32 0.6931472, %v953_v40  ;;  %vm594_vm3 = vcmp.lt.s32.totalorder %v586_v51, 256  ;;  %v607_v63 = vsel %vm593_vm15, %v562_v38, 0.0 }
 0x11b   : > { %v622_v54 = vadd.f32 %v621_v31, %v606_v42  ;;  %v339_v35 = vmin.f32 %v1464_v3, 0.0  ;;  %v530_v18 = vand.u32 2147483647, %v1583_v1  ;;  %v548_v32 = vand.u32 2147483647, %v1549_v6 }
 0x11c   : > { %v957_v20 = vpop.eup %956  ;;  %v538_v39 = vmul.f32 %v1540_v5, %v537_v28  ;;  %v520_v37 = vmul.f32 %v1573_v46, %v519_v10  ;;  %v544_v36 = vmul.f32 0.6931472, %v955_v47  ;;  %vm540_vm4 = vcmp.lt.f32.partialorder %v539_v33, 0.0004427343 }
 0x11d   : > { %v517_v60 = vmul.f32 0.6931472, %v957_v20  ;;  %vm522_vm5 = vcmp.lt.f32.partialorder %v521_v22, 0.0004427343  ;;  %v529_v55 = vmul.f32 %v1583_v1, %v528_v26  ;;  %v547_v15 = vmul.f32 %v1549_v6, %v546_v34 }
 0x11e   : > { %v959_v50 = vpop.eup %958  ;;  %v541_v59 = vsel %vm540_vm4, %v538_v39, %v535_v7  ;;  %v623_v16 = vadd.f32 %v622_v54, %v607_v63  ;;  %v340_v14 = vmin.f32 %v1492_v52, 0.0  ;;  %vm531_vm6 = vcmp.lt.f32.partialorder %v530_v18, 0.0004427343 }
 0x11f   : > { %v523_v9 = vsel %vm522_vm5, %v520_v37, %v517_v60  ;;  %v526_v3 = vmul.f32 0.6931472, %v959_v50  ;;  %vm549_vm7 = vcmp.lt.f32.partialorder %v548_v32, 0.0004427343  ;;  %v342_v46 = vmin.f32 %v1427_v62, 0.0 }
 0x120   : > { %v563_v61 = vsub.f32 %v339_v35, %v523_v9  ;;  %v550_v48 = vsel %vm549_vm7, %v547_v15, %v544_v36  ;;  %v565_v58 = vsub.f32 %v341_v23, %v541_v59  ;;  %vm595_vm8 = vcmp.lt.s32.totalorder %v587_v24, 256 }
 0x121   : > { %v532_v5 = vsel %vm531_vm6, %v529_v55, %v526_v3  ;;  %v566_v6 = vsub.f32 %v342_v46, %v550_v48  ;;  %vm639_vm9 = vcmask 0   ;;  %v1120_v41 = vmov (!%p779_p6), 0  }
 0x122   : > { %v564_v27 = vsub.f32 %v340_v14, %v532_v5  ;;  %v608_v30 = vsel %vm594_vm3, %v563_v61, 0.0  ;;  %v610_v17 = vsel %vm595_vm8, %v565_v58, 0.0  ;;  %960 = vset.pattern.permute.xlu0 (!%p779_p6), %v1120_v41  ;;  %v653_v43 = vsub.s32 (!%p779_p6), 0, %v1349_v56 }
 0x123   : > { %v624_v1 = vadd.f32 %v623_v16, %v608_v30  ;;  %v611_v52 = vsel %vm595_vm8, %v566_v6, 0.0 }
 0x124   : > { %v609_v45 = vsel %vm594_vm3, %v564_v27, 0.0 }
 0x125   : > { %v625_v53 = vadd.f32 %v624_v1, %v609_v45 }
 0x127   : > { %v626_v49 = vadd.f32 %v625_v53, %v610_v17 }
 0x129   : > { %v627_v0 = vadd.f32 %v626_v49, %v611_v52 }
 0x12b   : > { %628 = vadd.xlane.f32.xlu0 %v627_v0 }
 0x1b8   : > { %v629_v11 = vpop.xlane.xlu0 %628 }
 0x1b9   : > { %v630_v57 = vrot.slane %v629_v11, 4 }
 0x1bb   : > { %v631_v4 = vadd.f32 %v630_v57, %v629_v11 }
 0x1bd   : > { %v632_v19 = vrot.slane %v631_v4, 2 }
 0x1bf   : > { %v633_v62 = vadd.f32 %v632_v19, %v631_v4 }
 0x1c1   : > { %v634_v13 = vrot.slane %v633_v62, 1 }
 0x1c3   : > { %v635_v29 = vadd.f32 %v634_v13, %v633_v62 }
 0x1c5   : > { %785 = vpush %v635_v29 }
 0x1f4   : > { %644 = sbr.rel (%p779_p6) target bundleno = 645 (0x285), region = 40 }
 0x1f6   : > { %s786_s27 = spop %785 }
 0x1f7   : > { %v637_v2 = vstv %s786_s27 }
 0x1f8   : > { %v638_v25 = vadd.f32 %v637_v2, %v612_v12 }
 0x1fa   : > { %640 = vst.msk [vmem:[#allocation2] sm:$0x1] %vm639_vm9, %v638_v25 }
 0x201   : > { %v645_v21 = vld [vmem:[#allocation2] sm:$0x1] }
 0x202   : > { %648 = vperm.xlu0 %960, %v645_v21  }
 0x281   : > { %v649_v8 = vpop.permute.xlu0 %648 }
 0x282   : > { %v654_v51 = vrot.slane %v649_v8, %v653_v43 }
 0x284   : > { %655 = vst [vmem:[%s1310_s24] sm:$0x1] %v654_v51 }
 0x285 PF: > { %s780_s26 = sshll.u32 %s1101_s16, 4  ;;  %s669_s4 = sshll.u32 %s1310_s24, 4  ;;  %s670_s4 = int_to_ptr.vmem [resolvable:$true] %s669_s4 }
 0x286   : > { %s1631_s15 = scalar_lea.hbm %s1692_s2, %s780_s26  ;;  %s657_s30 = scalar_lea.sflag [#allocation5], %s220_s20 }
 0x287   : > { %s991_s29 = scalar_lea.vmem %s670_s4, 16  ;;  %p1718_p4 = scmp.ne.s32.totalorder %s1696_s8, 0 }
 0x288   : > { %p992_p1 = scmp.ne.s32.totalorder %s670_s4, %s991_s29  ;;  %s1121_s21 = smov [#allocation6]  }
 0x289   : > { %s995_s3 = sshll.u32 %s1121_s21, 4  ;;  %s996_s3 = int_to_ptr.vmem [resolvable:$false] %s995_s3 }
 0x28a   : > { %p993_p7 = pnand %p992_p1, %p1718_p4  ;;  %s997_s28 = scalar_lea.vmem %s996_s3, 32 }
 0x28b   : > { %p998_p5 = scmp.lt.s32.totalorder %s670_s4, %s996_s3  ;;  %p999_p12 = scmp.lt.s32.totalorder %s997_s28, %s991_s29 }
 0x28c   : > { %p994_p10 = pneg %p993_p7 }
 0x28d   : > { %p1000_p13 = por %p999_p12, %p998_p5 }
 0x28f   : > { %p1001_p8 = pnand %p1000_p13, %p994_p10 }
 0x291   : > { %1004 = shalt.err (!%p1001_p8)
}
 0x292   : > { %s1005_s16 = scalar_lea.hbm %s1631_s15, 16  ;;  %s1009_s27 = scalar_lea.hbm %s1692_s2, 32 }
 0x293   : > { %p1006_p11 = scmp.ne.s32.totalorder %s1631_s15, %s1005_s16  ;;  %p1010_p3 = scmp.lt.u32.totalorder %s1631_s15, %s1692_s2 }
 0x294   : > { %p1011_p9 = scmp.lt.u32.totalorder %s1009_s27, %s1005_s16  ;;  %p1013_p1 = scmp.lt.u32.totalorder %s1005_s16, %s1631_s15 }
 0x295   : > { %p1007_p0 = pnand %p1006_p11, %p1718_p4 }
 0x296   : > { %p1012_p6 = por %p1011_p9, %p1010_p3 }
 0x297   : > { %p1008_p2 = pneg %p1007_p0 }
 0x298   : > { %p1014_p7 = por %p1013_p1, %p1012_p6 }
 0x29a   : > { %p1015_p10 = pnand %p1014_p7, %p1008_p2 }
 0x29c   : > { %1018 = shalt.err (!%p1015_p10)
}
 0x29d   : > { %789 = dma.vmem_to_hbm [thread:$0]  (%p1718_p4), %s670_s4, 16, %s1631_s15, %s657_s30  }
 0x29e PF: > { %p800_p5 = scmp.ge.s32.totalorder %s1113_s19, 2  ;;  %s681_s25 = sand.u32 1, %s1073_s9  }
 0x29f   : > { %p1719_p12 = scmp.ne.s32.totalorder %s1697_s12, 0  ;;  %s682_s29 = scalar_lea.sflag [#allocation5], %s681_s25 }
 0x2a1   : > { %p796_p13 = pnand %p800_p5, %p1719_p12 }
 0x2a3   : > { %1068 = dma.done.wait (!%p796_p13), %s682_s29, 16  }
 0x2a4   : > { %1070 = vsyncadd (!%p796_p13), %s682_s29, 4294967280  ;;  %s18_s19 = sadd.s32 1, %s1113_s19   ;;  %s1720_s9 = smov %s1077_s10 }
 0x2a5   : > { %p15_p8 = scmp.ge.s32.totalorder %s18_s19, 6   ;;  %s1721_s10 = smov %s1081_s11 }
 0x2a6   : > { %s1722_s11 = smov %s1225_s5  ;;  %s1723_s12 = smov %s1089_s13 }
 0x2a7   : > { %s1724_s13 = smov %s1093_s14  ;;  %s1725_s14 = smov %s1236_s7 }
 0x2a8   : > { %s1726_s15 = smov %s1105_s17  ;;  %s1727_s16 = smov %s1109_s18 }
 0x2a9   : > { %s1728_s17 = smov %s1731_s22  ;;  %s1729_s18 = smov %s1737_s23 }
 0x2aa   :  { %17 = sbr.rel (!%p15_p8) target bundleno = 9 (0x9), region = 84 }
 0x2b1   :  { %686 = vsyncpa [#allocation4], 1 }
 0x2b2   :  { %688 = vsyncpa [#allocation4 + $0x1], 1 }
 0x2b3   :  { %689 = vsyncpa [#allocation5], 1 }
 0x2b4   :  { %691 = vsyncpa [#allocation5 + $0x1], 1 }

</bundles_post_ra>
